<compile_context>
chip_gen: v5e
topology: v5e:2x2
jax: 0.10.0
libtpu: 0.0.40
codegen_flags: <defaults>
</compile_context>

<pallas_src>
import functools

import jax
import jax.numpy as jnp
from jax.experimental import pallas as pl
from jax.experimental.pallas import tpu as pltpu

BN_EPS = 1e-5


# ----------------------------------------------------------------------------
# Hardware-aware limits / tiling helpers
# ----------------------------------------------------------------------------
@functools.lru_cache(maxsize=1)
def _vmem_limit_bytes():
    """Per-generation scoped-VMEM limit (half of physical, capped at 64 MiB)."""
    try:
        cap = int(pltpu.get_tpu_info().vmem_capacity_bytes)
        return int(min(cap // 2, 64 * 1024 * 1024))
    except Exception:
        return 32 * 1024 * 1024  # safe fallback on all generations


def _round_up(x, m):
    return (x + m - 1) // m * m


def _row_tiles(R, target=512):
    """Pick an M tile (multiple of 16 for bf16 sublane packing) and padded rows.

    Prefers >= 2 tiles so the "parallel" M axis can shard across v7x's two
    TensorCores; caps the tile at `target` rows (measured ~85% of HBM roofline
    at 512-row tiles) so double-buffered footprints stay small in VMEM.
    """
    Rp = _round_up(max(R, 1), 16)
    if Rp <= 16:
        return Rp, Rp
    tm = min(target, _round_up((Rp + 1) // 2, 16))
    Rp = _round_up(Rp, tm)
    return tm, Rp


# ----------------------------------------------------------------------------
# Pallas kernels
# ----------------------------------------------------------------------------
def _matmul_stats_kernel(a_ref, w_ref, z_ref, s_ref, q_ref):
    """Pass 1: z = A_tile @ W (full K, f32 accumulate); store z in bf16 and emit
    per-channel sum / sum-of-squares of the f32 result for the BN reduction."""
    z = jnp.dot(a_ref[...], w_ref[...], preferred_element_type=jnp.float32)
    z_ref[...] = z.astype(z_ref.dtype)
    s_ref[...] = jnp.sum(z, axis=0, keepdims=True)[None]
    q_ref[...] = jnp.sum(z * z, axis=0, keepdims=True)[None]


def _bn_apply_kernel(*refs, relu, has_res):
    """Pass 2: y = z*scale + shift (+res) (relu); scale/shift fold BN gamma/beta."""
    if has_res:
        z_ref, sc_ref, sh_ref, r_ref, o_ref = refs
    else:
        z_ref, sc_ref, sh_ref, o_ref = refs
    y = z_ref[...].astype(jnp.float32) * sc_ref[...] + sh_ref[...]
    if has_res:
        y = y + r_ref[...].astype(jnp.float32)
    if relu:
        y = jnp.maximum(y, 0.0)
    o_ref[...] = y.astype(o_ref.dtype)


def _maxpool_kernel(p_ref, o_ref):
    # p_ref: (9, tm, lanes) -> max over the 3x3 window axis (pure VPU, no XLU).
    o_ref[...] = jnp.max(p_ref[...], axis=0)


# ----------------------------------------------------------------------------
# Glue: im2col built directly in bf16 (halves patch-matrix HBM traffic vs f32)
# ----------------------------------------------------------------------------
def _im2col_bf16(x_nhwc, ksize, stride, pad):
    """Return (A (R, kh*kw*Cin) bf16, Ho, Wo); columns are tap-major, Cin fastest."""
    x = x_nhwc.astype(jnp.bfloat16)
    N, H, W, C = x.shape
    xp = jnp.pad(x, ((0, 0), (pad, pad), (pad, pad), (0, 0)))
    Ho = (H + 2 * pad - ksize) // stride + 1
    Wo = (W + 2 * pad - ksize) // stride + 1
    R = N * Ho * Wo
    cols = []
    for i in range(ksize):
        for j in range(ksize):
            sl = xp[
                :,
                i : i + stride * (Ho - 1) + 1 : stride,
                j : j + stride * (Wo - 1) + 1 : stride,
                :,
            ]
            cols.append(sl.reshape(R, C))
    A = jnp.concatenate(cols, axis=1)  # (R, kh*kw*Cin) bf16
    return A, Ho, Wo


# ----------------------------------------------------------------------------
# Fused conv (+BN +residual +relu) via two tiled Pallas kernels
# ----------------------------------------------------------------------------
def conv_bn(x_nhwc, w_oihw, gamma, beta, *, stride, pad, relu, residual=None):
    Cout, Cin, kh, kw = w_oihw.shape
    N = x_nhwc.shape[0]
    A, Ho, Wo = _im2col_bf16(x_nhwc, kh, stride, pad)
    R, K = A.shape

    tm, Rp = _row_tiles(R)
    Kp = _round_up(K, 128)        # lane-aligned contraction dim
    Cp = _round_up(Cout, 128)     # lane-dense output columns (no masked vst)
    nm = Rp // tm

    # Zero-padding does not perturb the matmul nor the batch statistics (which
    # divide by the true R).  K is NOT grid-tiled: (tm, Kp) bf16 + full weight
    # are <~3 MiB each for this module, far under the scoped VMEM limit.
    A = jnp.pad(A, ((0, Rp - R), (0, Kp - K)))
    Wm = jnp.transpose(w_oihw, (2, 3, 1, 0)).reshape(K, Cout).astype(jnp.bfloat16)
    Wm = jnp.pad(Wm, ((0, Kp - K), (0, Cp - Cout)))

    z, sums, sqs = pl.pallas_call(
        _matmul_stats_kernel,
        grid=(nm,),
        in_specs=[
            pl.BlockSpec((tm, Kp), lambda m: (m, 0)),
            pl.BlockSpec((Kp, Cp), lambda m: (0, 0)),  # constant index -> VMEM-resident
        ],
        out_specs=(
            pl.BlockSpec((tm, Cp), lambda m: (m, 0)),
            pl.BlockSpec((1, 1, Cp), lambda m: (m, 0, 0)),
            pl.BlockSpec((1, 1, Cp), lambda m: (m, 0, 0)),
        ),
        out_shape=(
            jax.ShapeDtypeStruct((Rp, Cp), jnp.bfloat16),
            jax.ShapeDtypeStruct((nm, 1, Cp), jnp.float32),
            jax.ShapeDtypeStruct((nm, 1, Cp), jnp.float32),
        ),
        compiler_params=pltpu.CompilerParams(
            dimension_semantics=("parallel",),
            vmem_limit_bytes=_vmem_limit_bytes(),
        ),
    )(A, Wm)

    # Cross-tile BN statistics over the FULL R rows (tiny Cout-sized glue, f32).
    mean = jnp.sum(sums, axis=0).reshape(Cp) / R
    ex2 = jnp.sum(sqs, axis=0).reshape(Cp) / R
    var = jnp.maximum(ex2 - mean * mean, 0.0)  # biased variance (training-mode BN)
    g = jnp.pad(gamma.astype(jnp.float32), (0, Cp - Cout), constant_values=1.0)
    b = jnp.pad(beta.astype(jnp.float32), (0, Cp - Cout))
    scale = g * jax.lax.rsqrt(var + BN_EPS)
    shift = b - mean * scale
    scale2d = scale.reshape(1, Cp)
    shift2d = shift.reshape(1, Cp)

    args = [z, scale2d, shift2d]
    in_specs = [
        pl.BlockSpec((tm, Cp), lambda m: (m, 0)),
        pl.BlockSpec((1, Cp), lambda m: (0, 0)),
        pl.BlockSpec((1, Cp), lambda m: (0, 0)),
    ]
    has_res = residual is not None
    if has_res:
        r = residual.astype(jnp.bfloat16).reshape(R, Cout)
        r = jnp.pad(r, ((0, Rp - R), (0, Cp - Cout)))
        args.append(r)
        in_specs.append(pl.BlockSpec((tm, Cp), lambda m: (m, 0)))

    kernel = functools.partial(_bn_apply_kernel, relu=relu, has_res=has_res)
    y = pl.pallas_call(
        kernel,
        grid=(nm,),
        in_specs=in_specs,
        out_specs=pl.BlockSpec((tm, Cp), lambda m: (m, 0)),
        out_shape=jax.ShapeDtypeStruct((Rp, Cp), jnp.bfloat16),
        compiler_params=pltpu.CompilerParams(
            dimension_semantics=("parallel",),
            vmem_limit_bytes=_vmem_limit_bytes(),
        ),
    )(*args)

    return y[:R, :Cout].reshape(N, Ho, Wo, Cout)


# ----------------------------------------------------------------------------
# MaxPool2d(kernel=3, stride=2, padding=1) as a tiled bf16 Pallas max-reduction
# ----------------------------------------------------------------------------
def maxpool_3x3_s2_p1(x_nhwc):
    N, H, W, C = x_nhwc.shape
    xb = x_nhwc.astype(jnp.bfloat16)
    xp = jnp.pad(xb, ((0, 0), (1, 1), (1, 1), (0, 0)), constant_values=-jnp.inf)
    Ho = (H + 2 - 3) // 2 + 1
    Wo = (W + 2 - 3) // 2 + 1
    R = N * Ho * Wo

    # Window-major stack (9, R, C) in bf16: strided slices, no 6-D transpose.
    wins = []
    for i in range(3):
        for j in range(3):
            sl = xp[:, i : i + 2 * (Ho - 1) + 1 : 2, j : j + 2 * (Wo - 1) + 1 : 2, :]
            wins.append(sl.reshape(R, C))
    P = jnp.stack(wins, axis=0)  # (9, R, C) bf16

    # Fold rows into lanes (C=64 -> pairs of rows -> 128 lanes) so stores are
    # full-lane, unmasked vst.
    f = 128 // C if (C < 128 and 128 % C == 0) else 1
    Rf = -(-R // f)
    tmf, Rfp = _row_tiles(Rf)
    Rp = Rfp * f
    nm = Rfp // tmf
    P = jnp.pad(P, ((0, 0), (0, Rp - R), (0, 0)), constant_values=-jnp.inf)
    P = P.reshape(9, Rfp, f * C)

    out = pl.pallas_call(
        _maxpool_kernel,
        grid=(nm,),
        in_specs=[pl.BlockSpec((9, tmf, f * C), lambda m: (0, m, 0))],
        out_specs=pl.BlockSpec((tmf, f * C), lambda m: (m, 0)),
        out_shape=jax.ShapeDtypeStruct((Rfp, f * C), jnp.bfloat16),
        compiler_params=pltpu.CompilerParams(
            dimension_semantics=("parallel",),
            vmem_limit_bytes=_vmem_limit_bytes(),
        ),
    )(P)
    out = out.reshape(Rp, C)[:R]
    return out.reshape(N, Ho, Wo, C)


# ----------------------------------------------------------------------------
# BasicBlock + ResNet.features
# ----------------------------------------------------------------------------
def basic_block(x_nhwc, p):
    identity = x_nhwc
    out = conv_bn(
        x_nhwc, p["conv1_w"], p["bn1_g"], p["bn1_b"],
        stride=p["stride"], pad=1, relu=True,
    )
    if "down_w" in p:
        identity = conv_bn(
            x_nhwc, p["down_w"], p["down_g"], p["down_b"],
            stride=p["stride"], pad=0, relu=False,
        )
    out = conv_bn(
        out, p["conv2_w"], p["bn2_g"], p["bn2_b"],
        stride=1, pad=1, relu=True, residual=identity,
    )
    return out


def resnet_features(x_nchw, params):
    x = jnp.transpose(x_nchw, (0, 2, 3, 1))  # NCHW -> NHWC (bf16 inside conv_bn)
    x = conv_bn(
        x, params["conv1_w"], params["bn1_g"], params["bn1_b"],
        stride=2, pad=3, relu=True,
    )
    x = maxpool_3x3_s2_p1(x)
    for layer_name in ("layer1", "layer2", "layer3"):
        for blk in params[layer_name]:
            x = basic_block(x, blk)
    return jnp.transpose(x, (0, 3, 1, 2)).astype(jnp.float32)  # NHWC -> NCHW


# ----------------------------------------------------------------------------
# Deterministic parameter initialization (matches the __init__ shapes)
# ----------------------------------------------------------------------------
def _kaiming_conv(key, cout, cin, k):
    # kaiming_normal_(mode='fan_out', nonlinearity='relu'): std = sqrt(2 / (cout*k*k))
    std = (2.0 / (cout * k * k)) ** 0.5
    return jax.random.normal(key, (cout, cin, k, k), dtype=jnp.float32) * std


def init_resnet_params(key, num_input_channels=3, layers=(1, 1, 1)):
    params = {}
    key, k = jax.random.split(key)
    params["conv1_w"] = _kaiming_conv(k, 64, num_input_channels, 7)
    params["bn1_g"] = jnp.ones((64,), jnp.float32)
    params["bn1_b"] = jnp.zeros((64,), jnp.float32)

    inplanes = 64
    for li, (planes, nblocks) in enumerate(zip((64, 128, 256), layers), start=1):
        blocks = []
        stride = 1  # _make_layer is called without stride -> always 1
        for bi in range(nblocks):
            blk_in = inplanes if bi == 0 else planes
            blk_stride = stride if bi == 0 else 1
            key, k1, k2, kd = jax.random.split(key, 4)
            blk = {
                "stride": blk_stride,
                "conv1_w": _kaiming_conv(k1, planes, blk_in, 3),
                "bn1_g": jnp.ones((planes,), jnp.float32),
                "bn1_b": jnp.zeros((planes,), jnp.float32),
                "conv2_w": _kaiming_conv(k2, planes, planes, 3),
                "bn2_g": jnp.ones((planes,), jnp.float32),
                "bn2_b": jnp.zeros((planes,), jnp.float32),
            }
            if bi == 0 and (blk_stride != 1 or blk_in != planes):
                blk["down_w"] = _kaiming_conv(kd, planes, blk_in, 1)
                blk["down_g"] = jnp.ones((planes,), jnp.float32)
                blk["down_b"] = jnp.zeros((planes,), jnp.float32)
            blocks.append(blk)
        params[f"layer{li}"] = blocks
        inplanes = planes
    return params


if __name__ == "__main__":
    key = jax.random.PRNGKey(0)
    kp, kx = jax.random.split(key)
    params = init_resnet_params(kp, num_input_channels=3, layers=(1, 1, 1))
    x = jax.random.normal(kx, (2, 3, 16, 16), dtype=jnp.float32)

    out = resnet_features(x, params)
    out = jax.block_until_ready(out)
    assert out.shape == (2, 256, 4, 4), out.shape
    assert bool(jnp.all(jnp.isfinite(out)))
    print("KERNEL_OK")
</pallas_src>

<mosaic_0001>
module attributes {stable_mosaic.version = 11 : i64} {
  func.func @_matmul_stats_kernel(%arg0: i32, %arg1: memref<64x256xbf16, #tpu.memory_space<vmem>>, %arg2: memref<256x128xbf16, #tpu.memory_space<vmem>>, %arg3: memref<64x128xbf16, #tpu.memory_space<vmem>>, %arg4: memref<1x1x128xf32, #tpu.memory_space<vmem>>, %arg5: memref<1x1x128xf32, #tpu.memory_space<vmem>>) attributes {dimension_semantics = [#tpu.dimension_semantics<parallel>], iteration_bounds = array<i64: 2>, scalar_prefetch = 0 : i64, scratch_operands = 0 : i64, tpu.core_type = #tpu.core_type<tc>, window_params = [{transform_indices = @transform_0, window_bounds = array<i64: 64, 256>}, {pipeline_mode = #tpu.pipeline_mode<synchronous>, transform_indices = @transform_1, window_bounds = array<i64: 256, 128>}, {transform_indices = @transform_2, window_bounds = array<i64: 64, 128>}, {transform_indices = @transform_3, window_bounds = array<i64: 1, 1, 128>}, {transform_indices = @transform_4, window_bounds = array<i64: 1, 1, 128>}]} {
    %c0 = arith.constant 0 : index
    %c0_0 = arith.constant 0 : index
    %0 = vector.load %arg1[%c0, %c0_0] : memref<64x256xbf16, #tpu.memory_space<vmem>>, vector<64x256xbf16>
    %c0_1 = arith.constant 0 : index
    %c0_2 = arith.constant 0 : index
    %1 = vector.load %arg2[%c0_1, %c0_2] : memref<256x128xbf16, #tpu.memory_space<vmem>>, vector<256x128xbf16>
    %cst = arith.constant dense<0.000000e+00> : vector<64x128xf32>
    %2 = tpu.matmul %0, %1, %cst {dimension_numbers = #tpu.dot_dimension_numbers<[1], [0], [0], [1], [0, 0, 1, 1], [], []>} : vector<64x256xbf16>, vector<256x128xbf16>, vector<64x128xf32> -> vector<64x128xf32>
    %3 = arith.truncf %2 : vector<64x128xf32> to vector<64x128xbf16>
    %c0_3 = arith.constant 0 : index
    %c0_4 = arith.constant 0 : index
    %4 = vector.load %arg3[%c0_3, %c0_4] : memref<64x128xbf16, #tpu.memory_space<vmem>>, vector<64x128xbf16>
    tpu.vector_store %arg3[%c0_3, %c0_4], %3 {strides = array<i32>} : memref<64x128xbf16, #tpu.memory_space<vmem>>, vector<64x128xbf16>,
    %cst_5 = arith.constant dense<0.000000e+00> : vector<128xf32>
    %5 = vector.multi_reduction <add>, %2, %cst_5 [0] : vector<64x128xf32> to vector<128xf32>
    %6 = vector.shape_cast %5 : vector<128xf32> to vector<1x128xf32>
    %7 = vector.shape_cast %6 : vector<1x128xf32> to vector<1x1x128xf32>
    %c0_6 = arith.constant 0 : index
    %c0_7 = arith.constant 0 : index
    %c0_8 = arith.constant 0 : index
    %8 = vector.load %arg4[%c0_6, %c0_7, %c0_8] : memref<1x1x128xf32, #tpu.memory_space<vmem>>, vector<1x1x128xf32>
    tpu.vector_store %arg4[%c0_6, %c0_7, %c0_8], %7 {strides = array<i32>} : memref<1x1x128xf32, #tpu.memory_space<vmem>>, vector<1x1x128xf32>,
    %9 = arith.mulf %2, %2 : vector<64x128xf32>
    %cst_9 = arith.constant dense<0.000000e+00> : vector<128xf32>
    %10 = vector.multi_reduction <add>, %9, %cst_9 [0] : vector<64x128xf32> to vector<128xf32>
    %11 = vector.shape_cast %10 : vector<128xf32> to vector<1x128xf32>
    %12 = vector.shape_cast %11 : vector<1x128xf32> to vector<1x1x128xf32>
    %c0_10 = arith.constant 0 : index
    %c0_11 = arith.constant 0 : index
    %c0_12 = arith.constant 0 : index
    %13 = vector.load %arg5[%c0_10, %c0_11, %c0_12] : memref<1x1x128xf32, #tpu.memory_space<vmem>>, vector<1x1x128xf32>
    tpu.vector_store %arg5[%c0_10, %c0_11, %c0_12], %12 {strides = array<i32>} : memref<1x1x128xf32, #tpu.memory_space<vmem>>, vector<1x1x128xf32>,
    return
  }
  func.func @transform_0(%arg0: i32) -> (i32, i32) {
    %c0_i32 = arith.constant 0 : i32
    %c0_i32_0 = arith.constant 0 : i32
    return %arg0, %c0_i32 : i32, i32
  }
  func.func @transform_1(%arg0: i32) -> (i32, i32) {
    %c0_i32 = arith.constant 0 : i32
    %c0_i32_0 = arith.constant 0 : i32
    %c0_i32_1 = arith.constant 0 : i32
    return %c0_i32, %c0_i32_0 : i32, i32
  }
  func.func @transform_2(%arg0: i32) -> (i32, i32) {
    %c0_i32 = arith.constant 0 : i32
    %c0_i32_0 = arith.constant 0 : i32
    return %arg0, %c0_i32 : i32, i32
  }
  func.func @transform_3(%arg0: i32) -> (i32, i32, i32) {
    %c0_i32 = arith.constant 0 : i32
    %c0_i32_0 = arith.constant 0 : i32
    %c0_i32_1 = arith.constant 0 : i32
    return %arg0, %c0_i32, %c0_i32_0 : i32, i32, i32
  }
  func.func @transform_4(%arg0: i32) -> (i32, i32, i32) {
    %c0_i32 = arith.constant 0 : i32
    %c0_i32_0 = arith.constant 0 : i32
    %c0_i32_1 = arith.constant 0 : i32
    return %arg0, %c0_i32, %c0_i32_0 : i32, i32, i32
  }
}

</mosaic_0001>

<bundles_post_ra>
// kernel: tpu_custom_call.1
= control target key start
LH: loop header
LB: loop body
LE: loop exit
PB: predicated region body
PF: predicated region fallthrough
CT: control target
= control target key end

     0   :  { %10 = vsyncpa [#allocation3], 0  ;;  %s1424_s0 = inlined_call_operand.hbm [shape: bf16[128,256], index: 0, kind: input, shape index: {}]   ;;  %s1425_s1 = inlined_call_operand.hbm [shape: bf16[256,128], index: 1, kind: input, shape index: {}]   ;;  %s1426_s2 = inlined_call_operand.hbm [shape: bf16[128,128], index: 2, kind: output, shape index: {0}]   ;;  %s1427_s3 = inlined_call_operand.hbm [shape: f32[2,1,128], index: 3, kind: output, shape index: {1}]   ;;  %s1428_s4 = inlined_call_operand.hbm [shape: f32[2,1,128], index: 4, kind: output, shape index: {2}]  }
   0x1   :  { %12 = vsyncpa [#allocation3 + $0x1], 0 }
   0x2   :  { %13 = vsyncpa [#allocation6], 0 }
   0x3   :  { %14 = vsyncpa [#allocation4], 0 }
   0x4   :  { %16 = vsyncpa [#allocation4 + $0x1], 0 }
   0x5   :  { %17 = vsyncpa [#allocation9], 0 }
   0x6   :  { %19 = vsyncpa [#allocation9 + $0x1], 0  ;;  %s1202_s15 = smov 0   ;;  %s1204_s16 = smov 0  }
   0x7   :  { %s1206_s17 = smov 0   ;;  %s1208_s18 = smov 0  }
   0x8 LB: > { %s1223_s19 = sadd.s32 4294967295, %s1168_s18   ;;  %s726_s20 = sadd.s32 4294967294, %s1168_s18   ;;  %s1168_s18 = sphi %s1208_s18, %s1438_s18   ;;  %s1164_s17 = sphi %s1206_s17, %s1437_s17   ;;  %s1160_s16 = sphi %s1204_s16, %s1436_s16   ;;  %s1156_s15 = sphi %s1202_s15, %s1435_s15  }
   0x9   : > { %p45_p0 = scmp.ne.s32.totalorder %s1160_s16, %s1156_s15  ;;  %p46_p1 = scmp.eq.s32.totalorder %s1223_s19, 0 }
   0xa   : > { %p90_p2 = scmp.eq.s32.totalorder %s1223_s19, 1  ;;  %p96_p3 = scmp.eq.s32.totalorder %s726_s20, 1 }
   0xb   : > { %p1234_p4 = por %p46_p1, %p45_p0  ;;  %p727_p5 = scmp.ge.s32.totalorder %s1168_s18, 1 }
   0xc   : > { %p1239_p6 = por %p96_p3, %p45_p0  ;;  %p155_p7 = scmp.lt.s32.totalorder %s1168_s18, 3 }
   0xd   : > { %s166_s25 = sshll.u32 %s1425_s1, 4  ;;  %s1170_s27 = smov [#allocation5]   ;;  %s167_s25 = int_to_ptr.hbm [resolvable:$true] %s166_s25 }
   0xe   : > { %p1247_p8 = pnand %p727_p5, %p155_p7  ;;  %s168_s28 = sshll.u32 %s1170_s27, 4  ;;  %s169_s28 = int_to_ptr.vmem [resolvable:$true] %s168_s28 }
   0xf   : > { %s1257_s29 = sadd.s32 1, %s1168_s18   ;;  %s1171_s30 = smov 64  }
  0x10   : > { %p917_p9 = pneg %p1247_p8  ;;  %s1172_s5 = smov 4  }
  0x11   : > { %s29_s6 = ssub.s32 %s1168_s18, %s1257_s29  ;;  %s32_s7 = sadd.s32 1, %s1164_s17 }
  0x12   : > { %p918_p10 = pnand %p917_p9, %p46_p1  ;;  %p30_p12 = scmp.eq.s32.totalorder %s29_s6, 0 }
  0x13   : > { %p39_p13 = scmp.ne.s32.totalorder %s1164_s17, %s1160_s16  ;;  %p40_p0 = scmp.eq.s32.totalorder %s1168_s18, 0 }
  0x14   : > { %920 = dma.hbm_to_vmem [thread:$0]  (!%p918_p10), %s167_s25, 2048, %s169_s28, [#allocation6], %s1171_s30, %s1171_s30, %s1172_s5  }
  0x15   : > { %p936_p3 = scmp.lt.s32.totalorder %s1168_s18, 2  ;;  %p41_p5 = por %p40_p0, %p39_p13 }
  0x16   : > { %s1267_s8 = scalar_select %p30_p12, %s1164_s17, %s32_s7  }
  0x17   : > { %p1271_p7 = por %p90_p2, %p39_p13  ;;  %s182_s10 = sand.u32 1, %s1164_s17  }
  0x18   : > { %s840_s11 = sshll.u32 %s1168_s18, 6  ;;  %s730_s12 = sshll.u32 %s182_s10, 6 }
  0x19   : > { %s192_s23 = scalar_lea.hbm %s1424_s0, %s840_s11  ;;  %s186_s25 = scalar_lea.vmem [#allocation2], %s730_s12 }
  0x1a   : > { %s193_s24 = sshll.u32 %s192_s23, 4  ;;  %s195_s27 = sshll.u32 %s186_s25, 4  ;;  %s194_s24 = int_to_ptr.hbm [resolvable:$true] %s193_s24  ;;  %s196_s27 = int_to_ptr.vmem [resolvable:$true] %s195_s27 }
  0x1b   : > { %p1282_p9 = pnand %p936_p3, %p41_p5  ;;  %s183_s30 = scalar_lea.sflag [#allocation3], %s182_s10 }
  0x1c   : > { %s1008_s5 = sshra.s32 %s194_s24, 4  ;;  %s1015_s12 = scalar_lea.hbm %s1424_s0, 128  ;;  %s1009_s5 = int_to_ptr.hbm [resolvable:$true] %s1008_s5 }
  0x1d   : > { %s1010_s6 = scalar_lea.hbm %s1009_s5, 64  ;;  %p1012_p10 = pneg %p1282_p9 }
  0x1e   : > { %p1011_p2 = scmp.ne.s32.totalorder %s1009_s5, %s1010_s6  ;;  %p1016_p0 = scmp.lt.s32.totalorder %s1009_s5, %s1424_s0 }
  0x1f   : > { %p1017_p3 = scmp.lt.s32.totalorder %s1015_s12, %s1010_s6 }
  0x20   : > { %p1013_p12 = pnand %p1012_p10, %p1011_p2 }
  0x21   : > { %p1018_p5 = por %p1017_p3, %p1016_p0 }
  0x22   : > { %p1014_p13 = pneg %p1013_p12 }
  0x24   : > { %p1019_p11 = pnand %p1018_p5, %p1014_p13 }
  0x26   : > { %1022 = shalt.err (!%p1019_p11)
}
  0x27   : > { %s1173_s10 = smov 128   ;;  %s1174_s23 = smov 8  }
  0x28   : > { %924 = dma.hbm_to_vmem [thread:$0]  (!%p1282_p9), %s194_s24, 1024, %s196_s27, %s183_s30, %s1173_s10, %s1173_s10, %s1174_s23  }
  0x29   : > { %207 = sbr.rel (%p1247_p8) target bundleno = 275 (0x113), region = 28  ;;  %s1299_s25 = sand.u32 (!%p1247_p8), 1, %s1160_s16  }
  0x2a   : > { %s735_s7 = sshll.u32 (!%p1247_p8), %s1299_s25, 6  ;;  %s210_s5 = scalar_lea.sflag (!%p1247_p8), [#allocation3], %s1299_s25 }
  0x2b   : > { %s1303_s6 = scalar_lea.vmem (!%p1247_p8), [#allocation2], %s735_s7 }
  0x2e   : > { %1139 = dma.done.wait (%p1234_p4), %s210_s5, 1024  }
  0x2f   : > { %1141 = vsyncadd (%p1234_p4), %s210_s5, 4294966272 }
  0x30   : > { %1143 = dma.done.wait (%p46_p1), [#allocation6], 2048  }
  0x31   : > { %1145 = vsyncadd (%p46_p1), [#allocation6], 4294965248  ;;  %v856_v0 = vld [vmem:[#allocation5 + $0x38] sm:$0xff]  ;;  %v855_v2 = vld [vmem:[#allocation5 + $0x30] sm:$0xff]  ;;  %s737_s21 = sshll.u32 %s1299_s25, 5  ;;  %s865_s24 = sshll.u32 %s1223_s19, 5 }
  0x32   : > { %v864_v1 = vld [vmem:[#allocation5 + $0x78] sm:$0xff]  ;;  %430 = vmatpush.bf16.msra.mxu0 %v856_v0  ;;  %889 = vmatpush.bf16.msra.mxu2 %v856_v0  ;;  %v863_v3 = vld [vmem:[#allocation5 + $0x70] sm:$0xff]  ;;  %v854_v4 = vld [vmem:[#allocation5 + $0x28] sm:$0xff]  ;;  %s1330_s26 = scalar_lea.vmem [#allocation7], %s737_s21  ;;  %s560_s30 = scalar_lea.hbm %s1426_s2, %s865_s24 }
  0x33   : > { %459 = vmatpush.bf16.msra.mxu1 %v864_v1  ;;  %897 = vmatpush.bf16.msra.mxu3 %v864_v1  ;;  %v862_v5 = vld [vmem:[#allocation5 + $0x68] sm:$0xff]  ;;  %v853_v6 = vld [vmem:[#allocation5 + $0x20] sm:$0xff]  ;;  %v852_v8 = vld [vmem:[#allocation5 + $0x18] sm:$0xff]  ;;  %s561_s11 = sshll.u32 %s1330_s26, 4  ;;  %s563_s12 = sshll.u32 %s560_s30, 4  ;;  %s1340_s11 = int_to_ptr.vmem [resolvable:$true] %s561_s11  ;;  %s564_s12 = int_to_ptr.hbm [resolvable:$true] %s563_s12 }
  0x34   : > { %v861_v7 = vld [vmem:[#allocation5 + $0x60] sm:$0xff]  ;;  %v860_v9 = vld [vmem:[#allocation5 + $0x58] sm:$0xff]  ;;  %v851_v10 = vld [vmem:[#allocation5 + $0x10] sm:$0xff]  ;;  %s541_s13 = scalar_lea.sflag [#allocation4], %s1299_s25  ;;  %s1052_s14 = sshra.s32 %s564_s12, 4  ;;  %s1053_s14 = int_to_ptr.hbm [resolvable:$true] %s1052_s14 }
  0x35   : > { %v859_v11 = vld [vmem:[#allocation5 + $0x50] sm:$0xff]  ;;  %v850_v12 = vld [vmem:[#allocation5 + $0x8] sm:$0xff]  ;;  %v849_v14 = vld [vmem:[#allocation5] sm:$0xff]  ;;  %s1054_s10 = scalar_lea.hbm %s1053_s14, 32  ;;  %s1058_s5 = scalar_lea.hbm %s1426_s2, 64 }
  0x36   : > { %431 = vmatpush.bf16.msra.mxu0 %v855_v2  ;;  %890 = vmatpush.bf16.msra.mxu2 %v855_v2  ;;  %v858_v13 = vld [vmem:[#allocation5 + $0x48] sm:$0xff]  ;;  %v857_v15 = vld [vmem:[#allocation5 + $0x40] sm:$0xff]  ;;  %v748_v28 = vld [vmem:[%s1303_s6 + $0x10] sm:$0xf]  ;;  %p1055_p1 = scmp.ne.s32.totalorder %s1053_s14, %s1054_s10  ;;  %p1059_p11 = scmp.lt.s32.totalorder %s1053_s14, %s1426_s2 }
  0x37   : > { %460 = vmatpush.bf16.msra.mxu1 %v863_v3  ;;  %898 = vmatpush.bf16.msra.mxu3 %v863_v3  ;;  %v740_v16 = vld [vmem:[%s1303_s6] sm:$0xf]  ;;  %v842_v17 = vld [vmem:[%s1303_s6 + $0x4] sm:$0xf0]  ;;  %v841_v20 = vld [vmem:[%s1303_s6 + $0x4] sm:$0xf]  ;;  %p1060_p9 = scmp.lt.s32.totalorder %s1058_s5, %s1054_s10 }
  0x38   : > { %v756_v18 = vld [vmem:[%s1303_s6 + $0x20] sm:$0xf]  ;;  %v846_v19 = vld [vmem:[%s1303_s6 + $0x24] sm:$0xf0]  ;;  %v742_v21 = vld [vmem:[%s1303_s6 + $0x8] sm:$0xf0]  ;;  %v741_v24 = vor.u32 %v842_v17, %v740_v16  ;;  %p1056_p4 = pnand %p1055_p1, %p1271_p7 }
  0x39   : > { %v845_v22 = vld [vmem:[%s1303_s6 + $0x24] sm:$0xf]  ;;  %v758_v23 = vld [vmem:[%s1303_s6 + $0x28] sm:$0xf0]  ;;  %v757_v25 = vor.u32 %v846_v19, %v756_v18  ;;  %v745_v26 = vor.u32 %v841_v20, %v742_v21  ;;  %v844_v29 = vld [vmem:[%s1303_s6 + $0x14] sm:$0xf0]  ;;  %p1061_p2 = por %p1060_p9, %p1059_p11 }
  0x3a   : > { %432 = vmatpush.bf16.msra.mxu0 %v854_v4  ;;  %891 = vmatpush.bf16.msra.mxu2 %v854_v4  ;;  %v761_v27 = vor.u32 %v845_v22, %v758_v23  ;;  %v764_v30 = vld [vmem:[%s1303_s6 + $0x30] sm:$0xf]  ;;  %v848_v31 = vld [vmem:[%s1303_s6 + $0x34] sm:$0xf0]  ;;  %v843_v32 = vld [vmem:[%s1303_s6 + $0x14] sm:$0xf]  ;;  %v749_v36 = vor.u32 %v844_v29, %v748_v28  ;;  %p1057_p8 = pneg %p1056_p4 }
  0x3b   : > { %461 = vmatpush.bf16.msra.mxu1 %v862_v5  ;;  %899 = vmatpush.bf16.msra.mxu3 %v862_v5  ;;  %v750_v33 = vld [vmem:[%s1303_s6 + $0x18] sm:$0xf0]  ;;  %v847_v34 = vld [vmem:[%s1303_s6 + $0x34] sm:$0xf]  ;;  %v765_v37 = vor.u32 %v848_v31, %v764_v30 }
  0x3c   : > { %v766_v35 = vld [vmem:[%s1303_s6 + $0x38] sm:$0xf0]  ;;  %v753_v38 = vor.u32 %v843_v32, %v750_v33  ;;  %p1062_p10 = pnand %p1061_p2, %p1057_p8 }
  0x3d   : > { %v769_v39 = vor.u32 %v847_v34, %v766_v35 }
  0x3e   : > { %433 = vmatpush.bf16.msra.mxu0 %v853_v6  ;;  %892 = vmatpush.bf16.msra.mxu2 %v853_v6 }
  0x3f   : > { %462 = vmatpush.bf16.msra.mxu1 %v861_v7  ;;  %900 = vmatpush.bf16.msra.mxu3 %v861_v7 }
  0x42   : > { %434 = vmatpush.bf16.msra.mxu0 %v852_v8  ;;  %893 = vmatpush.bf16.msra.mxu2 %v852_v8 }
  0x43   : > { %463 = vmatpush.bf16.msra.mxu1 %v860_v9  ;;  %901 = vmatpush.bf16.msra.mxu3 %v860_v9 }
  0x46   : > { %435 = vmatpush.bf16.msra.mxu0 %v851_v10  ;;  %894 = vmatpush.bf16.msra.mxu2 %v851_v10 }
  0x47   : > { %464 = vmatpush.bf16.msra.mxu1 %v859_v11  ;;  %902 = vmatpush.bf16.msra.mxu3 %v859_v11 }
  0x4a   : > { %436 = vmatpush.bf16.msra.mxu0 %v850_v12  ;;  %895 = vmatpush.bf16.msra.mxu2 %v850_v12 }
  0x4b   : > { %465 = vmatpush.bf16.msra.mxu1 %v858_v13  ;;  %903 = vmatpush.bf16.msra.mxu3 %v858_v13 }
  0x4e   : > { %437 = vmatpush.bf16.msra.mxu0 %v849_v14  ;;  %896 = vmatpush.bf16.msra.mxu2 %v849_v14 }
  0x4f   : > { %466 = vmatpush.bf16.msra.mxu1 %v857_v15  ;;  %904 = vmatpush.bf16.msra.mxu3 %v857_v15 }
  0x51   : > { %438 = vmatmul.bf16.vlgmr.msra.gmra.mxu0 %v741_v24  ;;  %448 = vmatmul.bf16.vlgmr.msra.gmra.mxu2 %v757_v25 }
  0x52   : > { %467 = vmatmul.bf16.vlgmr.msra.gmra.mxu1 %v745_v26  ;;  %477 = vmatmul.bf16.vlgmr.msra.gmra.mxu3 %v761_v27 }
  0x61   : > { %443 = vmatmul.bf16.gmra.mxu0 %v749_v36  ;;  %453 = vmatmul.bf16.gmra.mxu2 %v765_v37 }
  0x62   : > { %472 = vmatmul.bf16.gmra.mxu1 %v753_v38  ;;  %482 = vmatmul.bf16.gmra.mxu3 %v769_v39 }
  0xce   : > { %v439_v40 = vpop.f32.mrf.mxu0 }
  0xcf   : > { %v468_v41 = vpop.f32.mrf.mxu1 }
  0xd0   : > { %v469_v46 = vadd.f32 %v468_v41, %v439_v40 }
  0xd2   : > { %v518_v60 = vmul.f32 %v469_v46, %v469_v46 }
  0xd4   : > { %v449_v42 = vpop.f32.mrf.mxu2 }
  0xd5   : > { %v478_v43 = vpop.f32.mrf.mxu3 }
  0xd6   : > { %v441_v44 = vpop.f32.mrf.mxu0  ;;  %v479_v51 = vadd.f32 %v478_v43, %v449_v42 }
  0xd7   : > { %v470_v45 = vpop.f32.mrf.mxu1 }
  0xd8   : > { %v471_v47 = vadd.f32 %v470_v45, %v441_v44  ;;  %v522_v8 = vmul.f32 %v479_v51, %v479_v51 }
  0xda   : > { %v869_v48 = vpack.c.bf16 %v471_v47, %v469_v46  ;;  %v519_v57 = vmul.f32 %v471_v47, %v471_v47  ;;  %v504_v61 = vadd.f32 %v471_v47, %v469_v46 }
  0xdc   : > { %870 = vst [vmem:[%s1330_s26] sm:$0xff] %v869_v48   ;;  %v451_v49 = vpop.f32.mrf.mxu2  ;;  %v526_v1 = vadd.f32 %v519_v57, %v518_v60 }
  0xdd   : > { %v480_v50 = vpop.f32.mrf.mxu3 }
  0xde   : > { %v481_v52 = vadd.f32 %v480_v50, %v451_v49  ;;  %v444_v53 = vpop.f32.mrf.mxu0 }
  0xdf   : > { %v473_v54 = vpop.f32.mrf.mxu1 }
  0xe0   : > { %v879_v55 = vpack.c.bf16 %v481_v52, %v479_v51  ;;  %v474_v56 = vadd.f32 %v473_v54, %v444_v53  ;;  %v523_v14 = vmul.f32 %v481_v52, %v481_v52 }
  0xe2   : > { %887 = vst [vmem:[%s1330_s26 + $0x10] sm:$0xff] %v879_v55   ;;  %v520_v62 = vmul.f32 %v474_v56, %v474_v56  ;;  %v505_v2 = vadd.f32 %v504_v61, %v474_v56 }
  0xe4   : > { %v454_v58 = vpop.f32.mrf.mxu2  ;;  %v527_v4 = vadd.f32 %v526_v1, %v520_v62 }
  0xe5   : > { %v483_v59 = vpop.f32.mrf.mxu3 }
  0xe6   : > { %v446_v63 = vpop.f32.mrf.mxu0  ;;  %v484_v9 = vadd.f32 %v483_v59, %v454_v58 }
  0xe7   : > { %v475_v0 = vpop.f32.mrf.mxu1 }
  0xe8   : > { %v476_v3 = vadd.f32 %v475_v0, %v446_v63  ;;  %v524_v18 = vmul.f32 %v484_v9, %v484_v9 }
  0xea   : > { %v874_v5 = vpack.c.bf16 %v476_v3, %v474_v56  ;;  %v506_v6 = vadd.f32 %v505_v2, %v476_v3  ;;  %v521_v7 = vmul.f32 %v476_v3, %v476_v3 }
  0xec   : > { %886 = vst [vmem:[%s1330_s26 + $0x8] sm:$0xff] %v874_v5   ;;  %v507_v10 = vadd.f32 %v506_v6, %v479_v51  ;;  %v528_v11 = vadd.f32 %v527_v4, %v521_v7  ;;  %v456_v12 = vpop.f32.mrf.mxu2 }
  0xed   : > { %v485_v13 = vpop.f32.mrf.mxu3 }
  0xee   : > { %v529_v15 = vadd.f32 %v528_v11, %v522_v8  ;;  %v486_v16 = vadd.f32 %v485_v13, %v456_v12  ;;  %v508_v17 = vadd.f32 %v507_v10, %v481_v52 }
  0xf0   : > { %v884_v19 = vpack.c.bf16 %v486_v16, %v484_v9  ;;  %v509_v20 = vadd.f32 %v508_v17, %v484_v9  ;;  %v530_v21 = vadd.f32 %v529_v15, %v523_v14  ;;  %v525_v23 = vmul.f32 %v486_v16, %v486_v16 }
  0xf2   : > { %888 = vst [vmem:[%s1330_s26 + $0x18] sm:$0xff] %v884_v19   ;;  %v510_v22 = vadd.f32 %v509_v20, %v486_v16  ;;  %v531_v24 = vadd.f32 %v530_v21, %v524_v18 }
  0xf3   : > { %1065 = shalt.err (!%p1062_p10)
}
  0xf4   : > { %s1175_s26 = smov 64   ;;  %s1176_s24 = smov 4   ;;  %v511_v25 = vrot.slane %v510_v22, 4  ;;  %v532_v26 = vadd.f32 %v531_v24, %v525_v23 }
  0xf5   : > { %911 = dma.vmem_to_hbm [thread:$0]  (%p1271_p7), %s1340_s11, 512, %s564_s12, %s541_s13, %s1175_s26, %s1175_s26, %s1176_s24  }
  0xf6   : > { %v512_v27 = vadd.f32 %v511_v25, %v510_v22  ;;  %v533_v28 = vrot.slane %v532_v26, 4  ;;  %s575_s30 = scalar_lea.hbm %s1427_s3, %s1223_s19  ;;  %s545_s14 = sand.u32 1, %s1223_s19  }
  0xf7   : > { %s588_s7 = scalar_lea.hbm %s1428_s4, %s1223_s19  ;;  %s245_s5 = scalar_lea.vmem [#allocation8], %s1299_s25 }
  0xf8   : > { %v513_v29 = vrot.slane %v512_v27, 2  ;;  %v534_v30 = vadd.f32 %v533_v28, %v532_v26  ;;  %s1365_s11 = sshll.u32 %s245_s5, 4  ;;  %s1367_s12 = sshll.u32 %s575_s30, 4  ;;  %s578_s11 = int_to_ptr.vmem [resolvable:$true] %s1365_s11  ;;  %s580_s12 = int_to_ptr.hbm [resolvable:$true] %s1367_s12 }
  0xf9   : > { %s251_s13 = scalar_lea.vmem [#allocation10], %s1299_s25  ;;  %s1372_s21 = sshll.u32 %s588_s7, 4  ;;  %s593_s21 = int_to_ptr.hbm [resolvable:$true] %s1372_s21 }
  0xfa   : > { %v514_v31 = vadd.f32 %v513_v29, %v512_v27  ;;  %v535_v32 = vrot.slane %v534_v30, 2  ;;  %s1370_s6 = sshll.u32 %s251_s13, 4  ;;  %s546_s19 = scalar_lea.sflag [#allocation9], %s545_s14  ;;  %s591_s6 = int_to_ptr.vmem [resolvable:$true] %s1370_s6 }
  0xfb   : > { %s1080_s26 = sshra.s32 %s580_s12, 4  ;;  %s1086_s28 = scalar_lea.hbm %s1427_s3, 2  ;;  %s1081_s26 = int_to_ptr.hbm [resolvable:$true] %s1080_s26 }
  0xfc   : > { %v515_v33 = vrot.slane %v514_v31, 1  ;;  %v536_v34 = vadd.f32 %v535_v32, %v534_v30  ;;  %s1082_s24 = scalar_lea.hbm %s1081_s26, 1  ;;  %p1087_p3 = scmp.lt.s32.totalorder %s1081_s26, %s1427_s3 }
  0xfd   : > { %p1083_p12 = scmp.ne.s32.totalorder %s1081_s26, %s1082_s24  ;;  %p1088_p5 = scmp.lt.s32.totalorder %s1086_s28, %s1082_s24 }
  0xfe   : > { %v537_v35 = vrot.slane %v536_v34, 1  ;;  %v516_v36 = vadd.f32 %v515_v33, %v514_v31 }
  0xff   : > { %p1084_p13 = pnand %p1083_p12, %p1271_p7  ;;  %p1089_p1 = por %p1088_p5, %p1087_p3 }
 0x100   : > { %517 = vst [vmem:[%s245_s5] sm:$0x1] %v516_v36  ;;  %v538_v37 = vadd.f32 %v537_v35, %v536_v34 }
 0x101   : > { %p1085_p0 = pneg %p1084_p13 }
 0x103   : > { %p1090_p4 = pnand %p1089_p1, %p1085_p0 }
 0x105   : > { %1093 = shalt.err (!%p1090_p4)
}
 0x106   : > { %912 = dma.vmem_to_hbm [thread:$0]  (%p1271_p7), %s578_s11, 16, %s580_s12, %s546_s19   ;;  %539 = vst [vmem:[%s251_s13] sm:$0x1] %v538_v37 }
 0x107   : > { %s1108_s14 = sshra.s32 %s593_s21, 4  ;;  %s1114_s26 = scalar_lea.hbm %s1428_s4, 2  ;;  %s1109_s14 = int_to_ptr.hbm [resolvable:$true] %s1108_s14 }
 0x108   : > { %s1110_s23 = scalar_lea.hbm %s1109_s14, 1  ;;  %p1115_p2 = scmp.lt.s32.totalorder %s1109_s14, %s1428_s4 }
 0x109   : > { %p1111_p8 = scmp.ne.s32.totalorder %s1109_s14, %s1110_s23  ;;  %p1116_p10 = scmp.lt.s32.totalorder %s1114_s26, %s1110_s23 }
 0x10b   : > { %p1112_p11 = pnand %p1111_p8, %p1271_p7  ;;  %p1117_p12 = por %p1116_p10, %p1115_p2 }
 0x10d   : > { %p1113_p9 = pneg %p1112_p11 }
 0x10f   : > { %p1118_p13 = pnand %p1117_p12, %p1113_p9 }
 0x111   : > { %1121 = shalt.err (!%p1118_p13)
}
 0x112   : > { %913 = dma.vmem_to_hbm [thread:$0]  (%p1271_p7), %s591_s6, 16, %s593_s21, %s546_s19  }
 0x113 PF: > { %s604_s11 = sand.u32 1, %s1156_s15   ;;  %p1434_p0 = scmp.ge.s32.totalorder %s1168_s18, 2 }
 0x114   : > { %s605_s12 = scalar_lea.sflag [#allocation4], %s604_s11 }
 0x115   : > { %p926_p3 = pnand %p1434_p0, %p1239_p6 }
 0x117   : > { %p927_p5 = pneg %p926_p3 }
 0x119   : > { %1147 = dma.done.wait (%p927_p5), %s605_s12, 512  }
 0x11a   : > { %1149 = vsyncadd (%p927_p5), %s605_s12, 4294966784  ;;  %s614_s9 = sand.u32 1, %s726_s20  }
 0x11b   : > { %s615_s13 = scalar_lea.sflag [#allocation9], %s614_s9 }
 0x11c   : > { %1151 = dma.done.wait (%p927_p5), %s615_s13, 32  }
 0x11d   : > { %1153 = vsyncadd (%p927_p5), %s615_s13, 4294967264  ;;  %p22_p7 = scmp.ge.s32.totalorder %s1257_s29, 4   ;;  %s1435_s15 = smov %s1160_s16 }
 0x11e   : > { %s1436_s16 = smov %s1164_s17  ;;  %s1437_s17 = smov %s1267_s8 }
 0x11f   : > { %s1438_s18 = smov %s1257_s29  ;;  %24 = sbr.rel (!%p22_p7) target bundleno = 8 (0x8), region = 109 }
 0x124   :  { %629 = vsyncpa [#allocation3], 1 }
 0x125   :  { %631 = vsyncpa [#allocation3 + $0x1], 1 }
 0x126   :  { %632 = vsyncpa [#allocation6], 1 }
 0x127   :  { %633 = vsyncpa [#allocation4], 1 }
 0x128   :  { %635 = vsyncpa [#allocation4 + $0x1], 1 }
 0x129   :  { %636 = vsyncpa [#allocation9], 1 }
 0x12a   :  { %638 = vsyncpa [#allocation9 + $0x1], 1 }

</bundles_post_ra>
